<compile_context>
chip_gen: v7x
topology: tpu7x:2x2x1
jax: 0.10.0
libtpu: 0.0.40
codegen_flags: <defaults>
</compile_context>

<pallas_src>
import functools

import jax
import jax.numpy as jnp
from jax import lax
from jax.experimental import pallas as pl
from jax.experimental.pallas import tpu as pltpu


def _round_up(n, m):
    return ((n + m - 1) // m) * m


def _stem_accumulate(xcol_ref, convw_ref, convb_ref, acc_ref, *,
                     rows_per_tile, total_rows, apply_row_mask):
    """conv(3x3 via one K=9C matmul) + bias + ReLU + spatial-sum accumulation."""
    s = pl.program_id(1)

    @pl.when(s == 0)
    def _init():
        acc_ref[...] = jnp.zeros_like(acc_ref)

    # (rows, 9C) x (9C, FE_P) -> f32 (rows, FE_P): a single MXU push per tile.
    y = jnp.dot(xcol_ref[0], convw_ref[...], preferred_element_type=jnp.float32)
    act = jnp.maximum(y + convb_ref[...], 0.0)            # bias + ReLU (f32 VPU)

    if apply_row_mask:
        # Only emitted when H*W is not a multiple of the row tile: zero the
        # zero-padded tail rows (whose bias+ReLU would otherwise pollute the pool).
        ridx = lax.broadcasted_iota(jnp.int32, act.shape, 0) + s * rows_per_tile
        act = jnp.where(ridx < total_rows, act, 0.0)

    acc_ref[...] += jnp.sum(act, axis=0, keepdims=True)   # avg-pool numerator


def _posenet_fused_kernel(xcol_ref, convw_ref, convb_ref, fcw_ref, fcb_ref,
                          mask_ref, headw_ref, headb_ref, out_ref, acc_ref, *,
                          inv_hw, rows_per_tile, total_rows, apply_row_mask):
    """Small-batch path: conv stem + avg-pool + fe.fc + dropout + fused head."""
    _stem_accumulate(xcol_ref, convw_ref, convb_ref, acc_ref,
                     rows_per_tile=rows_per_tile, total_rows=total_rows,
                     apply_row_mask=apply_row_mask)

    @pl.when(pl.program_id(1) == pl.num_programs(1) - 1)
    def _finalize():
        pooled = (acc_ref[...] * inv_hw).astype(fcw_ref.dtype)   # adaptive avg pool
        x = jnp.dot(pooled, fcw_ref[...],
                    preferred_element_type=jnp.float32) + fcb_ref[...]
        x = jnp.maximum(x, 0.0) * mask_ref[0]                    # ReLU + scaled dropout
        out = jnp.dot(x.astype(headw_ref.dtype), headw_ref[...],
                      preferred_element_type=jnp.float32) + headb_ref[...]
        out_ref[0] = out.astype(out_ref.dtype)                   # lane-dense (1,128)


def _posenet_pool_kernel(xcol_ref, convw_ref, convb_ref, out_ref, acc_ref, *,
                         inv_hw, rows_per_tile, total_rows, apply_row_mask):
    """Large-batch path: conv stem + avg-pool only; the head is batched outside."""
    _stem_accumulate(xcol_ref, convw_ref, convb_ref, acc_ref,
                     rows_per_tile=rows_per_tile, total_rows=total_rows,
                     apply_row_mask=apply_row_mask)

    @pl.when(pl.program_id(1) == pl.num_programs(1) - 1)
    def _finalize():
        out_ref[0] = (acc_ref[...] * inv_hw).astype(out_ref.dtype)


def posenet_forward(rgbs, params, drop_mask, *, rows_per_tile=None,
                    fuse_head_max_batch=8):
    """rgbs: (B, C, H, W) float32 NCHW. Returns (B, 6) = cat(xyz, log_q)."""
    B, C, H, W = rgbs.shape
    fe_out = params["conv_w"].shape[-1]
    feat = params["fc_w"].shape[-1]
    FE_P = _round_up(fe_out, 128)
    FT_P = _round_up(feat, 128)
    OUT_P = 128                 # lane-dense head output, sliced to :6 afterwards
    K = 9 * C                   # full 3x3 im2col contraction depth
    total_rows = H * W

    # ---- generation-aware scoped-VMEM budget (v7x: 64 MiB/TC, v5e/v6e: 128 MiB) ----
    try:
        phys_vmem = int(pltpu.get_tpu_info().vmem_capacity_bytes)
    except Exception:
        phys_vmem = 64 * 1024 * 1024            # conservative (v7x) fallback
    vmem_limit = int(min((phys_vmem * 3) // 4, 96 * 1024 * 1024))

    # ---- spatial tile: largest im2col-row block that fits half the budget ----
    if rows_per_tile is None:
        per_row_bytes = 2 * (K * 2) + 3 * FE_P * 4   # dbl-buffered bf16 LHS + f32 temps
        rows_per_tile = (vmem_limit // 2) // per_row_bytes
    rows_per_tile = max(8, min(int(rows_per_tile), _round_up(total_rows, 8)))
    rows_per_tile = (rows_per_tile // 8) * 8
    num_s = -(-total_rows // rows_per_tile)
    padded_rows = num_s * rows_per_tile
    apply_row_mask = padded_rows != total_rows

    # ---- activations: NCHW -> padded NHWC -> (B, H*W, 9C) im2col, bf16 ----
    x = jnp.transpose(rgbs, (0, 2, 3, 1))                        # (B, H, W, C)
    xp = jnp.pad(x, ((0, 0), (1, 1), (1, 1), (0, 0)))            # (B, H+2, W+2, C)
    patches = [xp[:, dh:dh + H, dw:dw + W, :] for dh in range(3) for dw in range(3)]
    xcol = jnp.concatenate(patches, axis=-1).reshape(B, total_rows, K)
    if apply_row_mask:
        xcol = jnp.pad(xcol, ((0, 0), (0, padded_rows - total_rows), (0, 0)))
    xcol = xcol.astype(jnp.bfloat16)

    # ---- weights: feature dims padded to 128 lanes; bf16 MXU operands, f32 biases ----
    conv_w = params["conv_w"].reshape(K, fe_out)                 # (dh,dw,C) x fe_out
    conv_w = jnp.pad(conv_w, ((0, 0), (0, FE_P - fe_out))).astype(jnp.bfloat16)
    conv_b = jnp.pad(params["conv_b"], ((0, 0), (0, FE_P - fe_out))).astype(jnp.float32)

    fc_w = jnp.pad(params["fc_w"],
                   ((0, FE_P - fe_out), (0, FT_P - feat))).astype(jnp.bfloat16)
    fc_b = jnp.pad(params["fc_b"], ((0, 0), (0, FT_P - feat))).astype(jnp.float32)

    head_w = jnp.concatenate([params["wxyz"], params["wwpqr"]], axis=1)   # (feat, 6)
    head_w = jnp.pad(head_w, ((0, FT_P - feat), (0, OUT_P - 6))).astype(jnp.bfloat16)
    head_b = jnp.concatenate([params["bxyz"], params["bwpqr"]], axis=1)   # (1, 6)
    head_b = jnp.pad(head_b, ((0, 0), (0, OUT_P - 6))).astype(jnp.float32)

    mask = jnp.pad(drop_mask, ((0, 0), (0, FT_P - feat)),
                   constant_values=1.0).reshape(B, 1, FT_P).astype(jnp.float32)

    inv_hw = 1.0 / float(total_rows)
    const2 = lambda b, s: (0, 0)                 # resident weights: fetched once
    stem_specs = [
        pl.BlockSpec((1, rows_per_tile, K), lambda b, s: (b, s, 0)),   # im2col rows
        pl.BlockSpec((K, FE_P), const2),                               # conv weights
        pl.BlockSpec((1, FE_P), const2),                               # conv bias
    ]
    compiler_params = pltpu.CompilerParams(
        # batch tiles shard across v7x's 2 TCs; the row-tile axis is the reduction.
        dimension_semantics=("parallel", "arbitrary"),
        vmem_limit_bytes=vmem_limit,
    )
    kernel_kw = dict(inv_hw=inv_hw, rows_per_tile=rows_per_tile,
                     total_rows=total_rows, apply_row_mask=apply_row_mask)

    if B <= fuse_head_max_batch:
        # Tiny-batch path: fuse fe.fc + dropout + head into the last grid step.
        out = pl.pallas_call(
            functools.partial(_posenet_fused_kernel, **kernel_kw),
            out_shape=jax.ShapeDtypeStruct((B, 1, OUT_P), jnp.float32),
            grid=(B, num_s),
            in_specs=stem_specs + [
                pl.BlockSpec((FE_P, FT_P), const2),                  # fe.fc weight
                pl.BlockSpec((1, FT_P), const2),                     # fe.fc bias
                pl.BlockSpec((1, 1, FT_P), lambda b, s: (b, 0, 0)),  # dropout mask
                pl.BlockSpec((FT_P, OUT_P), const2),                 # fused head W
                pl.BlockSpec((1, OUT_P), const2),                    # fused head b
            ],
            out_specs=pl.BlockSpec((1, 1, OUT_P), lambda b, s: (b, 0, 0)),
            scratch_shapes=[pltpu.VMEM((1, FE_P), jnp.float32)],     # pool accumulator
            compiler_params=compiler_params,
        )(xcol, conv_w, conv_b, fc_w, fc_b, mask, head_w, head_b)
        return out[:, 0, :6]

    # Large-batch path: kernel emits pooled features; the head runs once as a
    # batched (B,FE_P)x(FE_P,FT_P)x(FT_P,OUT_P) matmul chain (M=B on the MXU).
    pooled = pl.pallas_call(
        functools.partial(_posenet_pool_kernel, **kernel_kw),
        out_shape=jax.ShapeDtypeStruct((B, 1, FE_P), jnp.float32),
        grid=(B, num_s),
        in_specs=stem_specs,
        out_specs=pl.BlockSpec((1, 1, FE_P), lambda b, s: (b, 0, 0)),
        scratch_shapes=[pltpu.VMEM((1, FE_P), jnp.float32)],
        compiler_params=compiler_params,
    )(xcol, conv_w, conv_b)
    p = pooled[:, 0, :].astype(jnp.bfloat16)
    x = jnp.dot(p, fc_w, preferred_element_type=jnp.float32) + fc_b
    x = jnp.maximum(x, 0.0) * mask[:, 0, :]
    out = jnp.dot(x.astype(jnp.bfloat16), head_w,
                  preferred_element_type=jnp.float32) + head_b
    return out[:, :6]


def init_params(key, c_in=3, k=3, fe_out_planes=32, feat_dim=64):
    """Kaiming-normal (fan_in) weights, zero biases, matching PoseNet.__init__
    for the fc layers; the 3x3 conv is a synthetic stand-in for the backbone body."""
    k0, k1, k2, k3 = jax.random.split(key, 4)
    fan_conv = c_in * k * k
    return {
        "conv_w": jax.random.normal(k0, (k, k, c_in, fe_out_planes), jnp.float32)
                  * jnp.sqrt(2.0 / fan_conv),
        "conv_b": jnp.zeros((1, fe_out_planes), jnp.float32),
        "fc_w": jax.random.normal(k1, (fe_out_planes, feat_dim), jnp.float32)
                * jnp.sqrt(2.0 / fe_out_planes),
        "fc_b": jnp.zeros((1, feat_dim), jnp.float32),
        "wxyz": jax.random.normal(k2, (feat_dim, 3), jnp.float32)
                * jnp.sqrt(2.0 / feat_dim),
        "bxyz": jnp.zeros((1, 3), jnp.float32),
        "wwpqr": jax.random.normal(k3, (feat_dim, 3), jnp.float32)
                 * jnp.sqrt(2.0 / feat_dim),
        "bwpqr": jnp.zeros((1, 3), jnp.float32),
    }


if __name__ == "__main__":
    B, C, H, W = 2, 3, 16, 16
    fe_out_planes, feat_dim, droprate = 32, 64, 0.5

    key = jax.random.PRNGKey(0)
    k_img, k_param, k_drop = jax.random.split(key, 3)

    rgbs = jax.random.normal(k_img, (B, C, H, W), jnp.float32)
    params = init_params(k_param, c_in=C, fe_out_planes=fe_out_planes,
                         feat_dim=feat_dim)

    # nn.Dropout (training mode) as a deterministic precomputed scaled mask.
    # Eval mode == all-ones mask.
    keep = 1.0 - droprate
    drop_mask = (jax.random.bernoulli(k_drop, keep, (B, feat_dim))
                 .astype(jnp.float32) / keep)

    # TODO(synk): two_stream branch (rgb+depth extractors, 2*feat_dim heads) and the
    # filter_hook backward NaN filter are not part of this forward kernel.

    out_fused = posenet_forward(rgbs, params, drop_mask)
    jax.block_until_ready(out_fused)
    assert out_fused.shape == (B, 6) and out_fused.dtype == jnp.float32
    assert bool(jnp.all(jnp.isfinite(out_fused)))

    # Exercise the large-batch (pool kernel + batched head) path on the same
    # inputs and check agreement with the fused path.
    out_split = posenet_forward(rgbs, params, drop_mask, fuse_head_max_batch=0)
    jax.block_until_ready(out_split)
    assert out_split.shape == (B, 6)
    assert bool(jnp.max(jnp.abs(out_split - out_fused)) < 1e-2)

    print("KERNEL_OK")
</pallas_src>

<mosaic_0001>
module attributes {stable_mosaic.version = 11 : i64} {
  func.func @_posenet_fused_kernel(%arg0: i32, %arg1: i32, %arg2: memref<1x256x27xbf16, #tpu.memory_space<vmem>>, %arg3: memref<27x128xbf16, #tpu.memory_space<vmem>>, %arg4: memref<1x128xf32, #tpu.memory_space<vmem>>, %arg5: memref<128x128xbf16, #tpu.memory_space<vmem>>, %arg6: memref<1x128xf32, #tpu.memory_space<vmem>>, %arg7: memref<1x1x128xf32, #tpu.memory_space<vmem>>, %arg8: memref<128x128xbf16, #tpu.memory_space<vmem>>, %arg9: memref<1x128xf32, #tpu.memory_space<vmem>>, %arg10: memref<1x1x128xf32, #tpu.memory_space<vmem>>, %arg11: memref<1x128xf32, #tpu.memory_space<vmem>>) attributes {dimension_semantics = [#tpu.dimension_semantics<parallel>, #tpu.dimension_semantics<arbitrary>], iteration_bounds = array<i64: 2, 1>, scalar_prefetch = 0 : i64, scratch_operands = 1 : i64, tpu.core_type = #tpu.core_type<tc>, window_params = [{transform_indices = @transform_0, window_bounds = array<i64: 1, 256, 27>}, {pipeline_mode = #tpu.pipeline_mode<synchronous>, transform_indices = @transform_1, window_bounds = array<i64: 27, 128>}, {pipeline_mode = #tpu.pipeline_mode<synchronous>, transform_indices = @transform_2, window_bounds = array<i64: 1, 128>}, {pipeline_mode = #tpu.pipeline_mode<synchronous>, transform_indices = @transform_3, window_bounds = array<i64: 128, 128>}, {pipeline_mode = #tpu.pipeline_mode<synchronous>, transform_indices = @transform_4, window_bounds = array<i64: 1, 128>}, {transform_indices = @transform_5, window_bounds = array<i64: 1, 1, 128>}, {pipeline_mode = #tpu.pipeline_mode<synchronous>, transform_indices = @transform_6, window_bounds = array<i64: 128, 128>}, {pipeline_mode = #tpu.pipeline_mode<synchronous>, transform_indices = @transform_7, window_bounds = array<i64: 1, 128>}, {transform_indices = @transform_8, window_bounds = array<i64: 1, 1, 128>}]} {
    %c0_i32 = arith.constant 0 : i32
    %0 = arith.cmpi eq, %arg1, %c0_i32 : i32
    %1 = arith.extui %0 : i1 to i32
    %c0_i32_0 = arith.constant 0 : i32
    %2 = arith.cmpi ne, %1, %c0_i32_0 : i32
    scf.if %2 {
      %cst_15 = arith.constant 0.000000e+00 : f32
      %20 = vector.broadcast %cst_15 : f32 to vector<1x128xf32>
      %c0_16 = arith.constant 0 : index
      %c0_17 = arith.constant 0 : index
      %21 = vector.load %arg11[%c0_16, %c0_17] : memref<1x128xf32, #tpu.memory_space<vmem>>, vector<1x128xf32>
      tpu.vector_store %arg11[%c0_16, %c0_17], %20 {strides = array<i32>} : memref<1x128xf32, #tpu.memory_space<vmem>>, vector<1x128xf32>,
    } else {
    }
    %c0 = arith.constant 0 : index
    %c0_1 = arith.constant 0 : index
    %c0_2 = arith.constant 0 : index
    %3 = vector.load %arg2[%c0, %c0_1, %c0_2] : memref<1x256x27xbf16, #tpu.memory_space<vmem>>, vector<1x256x27xbf16>
    %4 = vector.shape_cast %3 : vector<1x256x27xbf16> to vector<256x27xbf16>
    %c0_3 = arith.constant 0 : index
    %c0_4 = arith.constant 0 : index
    %5 = vector.load %arg3[%c0_3, %c0_4] : memref<27x128xbf16, #tpu.memory_space<vmem>>, vector<27x128xbf16>
    %cst = arith.constant dense<0.000000e+00> : vector<256x128xf32>
    %6 = tpu.matmul %4, %5, %cst {dimension_numbers = #tpu.dot_dimension_numbers<[1], [0], [0], [1], [0, 0, 1, 1], [], []>} : vector<256x27xbf16>, vector<27x128xbf16>, vector<256x128xf32> -> vector<256x128xf32>
    %c0_5 = arith.constant 0 : index
    %c0_6 = arith.constant 0 : index
    %7 = vector.load %arg4[%c0_5, %c0_6] : memref<1x128xf32, #tpu.memory_space<vmem>>, vector<1x128xf32>
    %8 = vector.broadcast %7 : vector<1x128xf32> to vector<256x128xf32>
    %9 = arith.addf %6, %8 : vector<256x128xf32>
    %cst_7 = arith.constant 0.000000e+00 : f32
    %10 = vector.broadcast %cst_7 : f32 to vector<256x128xf32>
    %11 = arith.maximumf %9, %10 : vector<256x128xf32>
    %c0_8 = arith.constant 0 : index
    %c0_9 = arith.constant 0 : index
    %12 = vector.load %arg11[%c0_8, %c0_9] : memref<1x128xf32, #tpu.memory_space<vmem>>, vector<1x128xf32>
    %cst_10 = arith.constant dense<0.000000e+00> : vector<128xf32>
    %13 = vector.multi_reduction <add>, %11, %cst_10 [0] : vector<256x128xf32> to vector<128xf32>
    %14 = vector.shape_cast %13 : vector<128xf32> to vector<1x128xf32>
    %15 = arith.addf %12, %14 : vector<1x128xf32>
    %c0_11 = arith.constant 0 : index
    %c0_12 = arith.constant 0 : index
    %16 = vector.load %arg11[%c0_11, %c0_12] : memref<1x128xf32, #tpu.memory_space<vmem>>, vector<1x128xf32>
    tpu.vector_store %arg11[%c0_11, %c0_12], %15 {strides = array<i32>} : memref<1x128xf32, #tpu.memory_space<vmem>>, vector<1x128xf32>,
    %c0_i32_13 = arith.constant 0 : i32
    %17 = arith.cmpi eq, %arg1, %c0_i32_13 : i32
    %18 = arith.extui %17 : i1 to i32
    %c0_i32_14 = arith.constant 0 : i32
    %19 = arith.cmpi ne, %18, %c0_i32_14 : i32
    scf.if %19 {
      %c0_15 = arith.constant 0 : index
      %c0_16 = arith.constant 0 : index
      %20 = vector.load %arg11[%c0_15, %c0_16] : memref<1x128xf32, #tpu.memory_space<vmem>>, vector<1x128xf32>
      %cst_17 = arith.constant 3.906250e-03 : f32
      %21 = vector.broadcast %cst_17 : f32 to vector<1x128xf32>
      %22 = arith.mulf %20, %21 : vector<1x128xf32>
      %23 = arith.truncf %22 : vector<1x128xf32> to vector<1x128xbf16>
      %c0_18 = arith.constant 0 : index
      %c0_19 = arith.constant 0 : index
      %24 = vector.load %arg5[%c0_18, %c0_19] : memref<128x128xbf16, #tpu.memory_space<vmem>>, vector<128x128xbf16>
      %cst_20 = arith.constant dense<0.000000e+00> : vector<1x128xf32>
      %25 = tpu.matmul %23, %24, %cst_20 {dimension_numbers = #tpu.dot_dimension_numbers<[1], [0], [0], [1], [0, 0, 1, 1], [], []>} : vector<1x128xbf16>, vector<128x128xbf16>, vector<1x128xf32> -> vector<1x128xf32>
      %c0_21 = arith.constant 0 : index
      %c0_22 = arith.constant 0 : index
      %26 = vector.load %arg6[%c0_21, %c0_22] : memref<1x128xf32, #tpu.memory_space<vmem>>, vector<1x128xf32>
      %27 = arith.addf %25, %26 : vector<1x128xf32>
      %cst_23 = arith.constant 0.000000e+00 : f32
      %28 = vector.broadcast %cst_23 : f32 to vector<1x128xf32>
      %29 = arith.maximumf %27, %28 : vector<1x128xf32>
      %c0_24 = arith.constant 0 : index
      %c0_25 = arith.constant 0 : index
      %c0_26 = arith.constant 0 : index
      %30 = vector.load %arg7[%c0_24, %c0_25, %c0_26] : memref<1x1x128xf32, #tpu.memory_space<vmem>>, vector<1x1x128xf32>
      %31 = vector.shape_cast %30 : vector<1x1x128xf32> to vector<1x128xf32>
      %32 = arith.mulf %29, %31 : vector<1x128xf32>
      %33 = arith.truncf %32 : vector<1x128xf32> to vector<1x128xbf16>
      %c0_27 = arith.constant 0 : index
      %c0_28 = arith.constant 0 : index
      %34 = vector.load %arg8[%c0_27, %c0_28] : memref<128x128xbf16, #tpu.memory_space<vmem>>, vector<128x128xbf16>
      %cst_29 = arith.constant dense<0.000000e+00> : vector<1x128xf32>
      %35 = tpu.matmul %33, %34, %cst_29 {dimension_numbers = #tpu.dot_dimension_numbers<[1], [0], [0], [1], [0, 0, 1, 1], [], []>} : vector<1x128xbf16>, vector<128x128xbf16>, vector<1x128xf32> -> vector<1x128xf32>
      %c0_30 = arith.constant 0 : index
      %c0_31 = arith.constant 0 : index
      %36 = vector.load %arg9[%c0_30, %c0_31] : memref<1x128xf32, #tpu.memory_space<vmem>>, vector<1x128xf32>
      %37 = arith.addf %35, %36 : vector<1x128xf32>
      %c0_32 = arith.constant 0 : index
      %c0_33 = arith.constant 0 : index
      %c0_34 = arith.constant 0 : index
      %38 = vector.load %arg10[%c0_32, %c0_33, %c0_34] : memref<1x1x128xf32, #tpu.memory_space<vmem>>, vector<1x1x128xf32>
      %39 = vector.shape_cast %38 : vector<1x1x128xf32> to vector<1x128xf32>
      %40 = vector.shape_cast %37 : vector<1x128xf32> to vector<1x1x128xf32>
      tpu.vector_store %arg10[%c0_32, %c0_33, %c0_34], %40 {strides = array<i32>} : memref<1x1x128xf32, #tpu.memory_space<vmem>>, vector<1x1x128xf32>,
    } else {
    }
    return
  }
  func.func @transform_0(%arg0: i32, %arg1: i32) -> (i32, i32, i32) {
    %c0_i32 = arith.constant 0 : i32
    %c0_i32_0 = arith.constant 0 : i32
    return %arg0, %arg1, %c0_i32 : i32, i32, i32
  }
  func.func @transform_1(%arg0: i32, %arg1: i32) -> (i32, i32) {
    %c0_i32 = arith.constant 0 : i32
    %c0_i32_0 = arith.constant 0 : i32
    %c0_i32_1 = arith.constant 0 : i32
    return %c0_i32, %c0_i32_0 : i32, i32
  }
  func.func @transform_2(%arg0: i32, %arg1: i32) -> (i32, i32) {
    %c0_i32 = arith.constant 0 : i32
    %c0_i32_0 = arith.constant 0 : i32
    %c0_i32_1 = arith.constant 0 : i32
    return %c0_i32, %c0_i32_0 : i32, i32
  }
  func.func @transform_3(%arg0: i32, %arg1: i32) -> (i32, i32) {
    %c0_i32 = arith.constant 0 : i32
    %c0_i32_0 = arith.constant 0 : i32
    %c0_i32_1 = arith.constant 0 : i32
    return %c0_i32, %c0_i32_0 : i32, i32
  }
  func.func @transform_4(%arg0: i32, %arg1: i32) -> (i32, i32) {
    %c0_i32 = arith.constant 0 : i32
    %c0_i32_0 = arith.constant 0 : i32
    %c0_i32_1 = arith.constant 0 : i32
    return %c0_i32, %c0_i32_0 : i32, i32
  }
  func.func @transform_5(%arg0: i32, %arg1: i32) -> (i32, i32, i32) {
    %c0_i32 = arith.constant 0 : i32
    %c0_i32_0 = arith.constant 0 : i32
    %c0_i32_1 = arith.constant 0 : i32
    return %arg0, %c0_i32, %c0_i32_0 : i32, i32, i32
  }
  func.func @transform_6(%arg0: i32, %arg1: i32) -> (i32, i32) {
    %c0_i32 = arith.constant 0 : i32
    %c0_i32_0 = arith.constant 0 : i32
    %c0_i32_1 = arith.constant 0 : i32
    return %c0_i32, %c0_i32_0 : i32, i32
  }
  func.func @transform_7(%arg0: i32, %arg1: i32) -> (i32, i32) {
    %c0_i32 = arith.constant 0 : i32
    %c0_i32_0 = arith.constant 0 : i32
    %c0_i32_1 = arith.constant 0 : i32
    return %c0_i32, %c0_i32_0 : i32, i32
  }
  func.func @transform_8(%arg0: i32, %arg1: i32) -> (i32, i32, i32) {
    %c0_i32 = arith.constant 0 : i32
    %c0_i32_0 = arith.constant 0 : i32
    %c0_i32_1 = arith.constant 0 : i32
    return %arg0, %c0_i32, %c0_i32_0 : i32, i32, i32
  }
}

</mosaic_0001>

<bundles_post_ra>
// kernel: tpu_custom_call.1
= control target key start
LH: loop header
LB: loop body
LE: loop exit
PB: predicated region body
PF: predicated region fallthrough
CT: control target
= control target key end

     0   :  { %13 = vsyncpa [#allocation4], 0  ;;  %s1752_s0 = inlined_call_operand.vmem [shape: bf16[2,256,27], index: 0, kind: input, shape index: {}]   ;;  %s1753_s1 = inlined_call_operand.vmem [shape: bf16[27,128], index: 1, kind: input, shape index: {}]   ;;  %s1754_s2 = inlined_call_operand.vmem [shape: f32[1,128], index: 2, kind: input, shape index: {}]   ;;  %s1755_s3 = inlined_call_operand.vmem [shape: bf16[128,128], index: 3, kind: input, shape index: {}]   ;;  %s1756_s4 = inlined_call_operand.vmem [shape: f32[1,128], index: 4, kind: input, shape index: {}]   ;;  %s1757_s5 = inlined_call_operand.vmem [shape: f32[2,1,128], index: 5, kind: input, shape index: {}]   ;;  %s1758_s6 = inlined_call_operand.vmem [shape: bf16[128,128], index: 6, kind: input, shape index: {}]   ;;  %s1759_s7 = inlined_call_operand.vmem [shape: f32[1,128], index: 7, kind: input, shape index: {}]   ;;  %s1760_s8 = inlined_call_operand.hbm [shape: f32[2,1,128], index: 8, kind: output, shape index: {}]  }
   0x1   :  { %15 = vsyncpa [#allocation4 + $0x1], 0  ;;  %s1481_s27 = smov 0   ;;  %s1483_s28 = smov 0  }
   0x2   :  { %s1485_s29 = smov 0   ;;  %s1487_s30 = smov 0  }
   0x3   :  { %s1489_s9 = smov 0   ;;  %s1491_s10 = smov 0  }
   0x4 LB: > { %s1086_s11 = sadd.s32 4294967295, %s1430_s10   ;;  %s1087_s12 = sadd.s32 4294967294, %s1430_s10   ;;  %s1430_s10 = sphi %s1491_s10, %s21_s10   ;;  %s1426_s9 = sphi %s1489_s9, %s1767_s9   ;;  %s1422_s30 = sphi %s1487_s30, %s1766_s30   ;;  %s1418_s29 = sphi %s1485_s29, %s1765_s29   ;;  %s1414_s28 = sphi %s1483_s28, %s1764_s28   ;;  %s1410_s27 = sphi %s1481_s27, %s1763_s27  }
   0x5   : > { %s33_s13 = sadd.s32 1, %s1426_s9  ;;  %s220_s14 = sadd.s32 1, %s1418_s29 }
   0x6   : > { %p35_p0 = scmp.ge.s32.totalorder %s33_s13, 2  ;;  %p230_p1 = scmp.ne.s32.totalorder %s1418_s29, %s1414_s28 }
   0x7   : > { %p231_p2 = scmp.eq.s32.totalorder %s1086_s11, 1  ;;  %p236_p3 = scmp.ne.s32.totalorder %s1414_s28, %s1410_s27 }
   0x8   : > { %s1769_s13 = smov (%p35_p0, %s33_s13), 0  ;;  %p237_p5 = scmp.eq.s32.totalorder %s1087_s12, 1 }
   0x9   : > { %p1521_p4 = por %p231_p2, %p230_p1  ;;  %s217_s16 = ssub.s32 %s1426_s9, %s1769_s13 }
   0xa   : > { %p1090_p6 = scmp.ge.s32.totalorder %s1430_s10, 1  ;;  %p218_p7 = scmp.eq.s32.totalorder %s217_s16, 0 }
   0xb   : > { %p1528_p8 = por %p237_p5, %p236_p3  ;;  %p292_p9 = scmp.lt.s32.totalorder %s1430_s10, 3 }
   0xc   : > { %s1534_s18 = scalar_select %p218_p7, %s1418_s29, %s220_s14  }
   0xd   : > { %p293_p10 = pnand %p1090_p6, %p292_p9 }
   0xe   : > { %v1318_v0 = vld [vmem:[%s1753_s1] sm:$0xff] (!%p293_p10)   ;;  %vm534_vm0 = vcmask (!%p293_p10), 1044480   ;;  %v1319_v1 = vld [vmem:[%s1753_s1 + $0x8] sm:$0x3f] (!%p293_p10)   ;;  %vm535_vm1 = vcmask (!%p293_p10), 1045504   ;;  %p333_p11 = scmp.lt.s32.totalorder (!%p293_p10), %s1422_s30, 1 }
   0xf   : > { %296 = sbr.rel (%p293_p10) target bundleno = 783 (0x30f), region = 52  ;;  %1184 = vmatprep.subr.bf16.mxu0 (!%p293_p10), %v1318_v0  ;;  %v1432_v2 = vmov (!%p293_p10), 65535   ;;  %vm485_vm2 = vcmask (!%p293_p10), 220160   ;;  %v1433_v22 = vmov (!%p293_p10), 0.0   ;;  %v1336_v23 = vld [vmem:[%s1755_s3] sm:$0xff] (!%p293_p10)   ;;  %v1337_v24 = vld [vmem:[%s1755_s3 + $0x8] sm:$0xff] (!%p293_p10)  }
  0x10   : > { %1185 = vmatpush3.bf16.msra.mxu0 (!%p293_p10), %v1318_v0  ;;  %v536_v3 = vsel (!%p293_p10), %vm534_vm0, 4294967295, %v1432_v2  ;;  %350 = vst [vmem:[#allocation2] sm:$0x1] (!%p293_p10), %v1433_v22  ;;  %1220 = vmatprep.subr.bf16.mxu1 (!%p293_p10), %v1433_v22  ;;  %v1338_v25 = vld [vmem:[%s1755_s3 + $0x10] sm:$0xff] (!%p293_p10)   ;;  %v1339_v26 = vld [vmem:[%s1755_s3 + $0x18] sm:$0xff] (!%p293_p10)   ;;  %v1340_v27 = vld [vmem:[%s1755_s3 + $0x20] sm:$0xff] (!%p293_p10)  }
  0x11   : > { %v537_v4 = vsel (!%p293_p10), %vm535_vm1, %v536_v3, 0  ;;  %1221 = vmatpush3.bf16.msra.mxu1 (!%p293_p10), %v1336_v23  ;;  %v1341_v28 = vld [vmem:[%s1755_s3 + $0x28] sm:$0xff] (!%p293_p10)   ;;  %v1342_v29 = vld [vmem:[%s1755_s3 + $0x30] sm:$0xff] (!%p293_p10)   ;;  %vm1434_vm3 = vmmov (!%p293_p10), 0   ;;  %v1343_v30 = vld [vmem:[%s1755_s3 + $0x38] sm:$0xff] (!%p293_p10)   ;;  %s330_s22 = sand.u32 (!%p293_p10), 1, %s1414_s28  }
  0x12   : > { %v539_v5 = vand.u32 (!%p293_p10), %v1319_v1, %v537_v4  ;;  %1222 = vmatprep.subr.bf16.mxu1 (!%p293_p10), %v1433_v22  ;;  %1236 = vmatprep.mubr.msk.bf16.mxu1 (!%p293_p10), %vm1434_vm3, %v1433_v22  ;;  %v1623_v31 = vld [vmem:[%s1754_s2] ss:$0 sm:$0xff] (!%p293_p10)  ;;  %s1144_s26 = sshll.u32 (!%p293_p10), %s1422_s30, 4  ;;  %s996_s19 = scalar_lea.sflag (!%p293_p10), [#allocation4], %s330_s22 }
  0x13   : > { %s1705_s16 = scalar_lea.hbm (!%p293_p10), %s1760_s8, %s1144_s26  ;;  %s1435_s20 = smov (!%p293_p10), [#allocation3]  }
  0x14   : > { %1186 = vmatprep.subr.bf16.mxu0 (!%p293_p10), %v539_v5 }
  0x15   : > { %1187 = vmatpush3.bf16.msra.mxu0 (!%p293_p10), %v539_v5  ;;  %1223 = vmatpush3.bf16.msra.mxu1 (!%p293_p10), %v1337_v24 }
  0x16   : > { %s1544_s23 = scalar_select %p333_p11, %s1422_s30, 1  ;;  %1224 = vmatprep.subr.bf16.mxu1 %v1433_v22 }
  0x18   : > { %s1147_s24 = sshll.u32 %s1544_s23, 7  ;;  %s344_s21 = scalar_lea.vmem %s1757_s5, %s1544_s23 }
  0x19   : > { %s1550_s11 = scalar_lea.vmem %s1752_s0, %s1147_s24  ;;  %1225 = vmatpush3.bf16.msra.mxu1 %v1338_v25 }
  0x1a   : > { %v1320_v6 = vld [vmem:[%s1550_s11] sm:$0xff]   ;;  %v1321_v7 = vld [vmem:[%s1550_s11 + $0x8] sm:$0xff]   ;;  %v1322_v8 = vld [vmem:[%s1550_s11 + $0x10] sm:$0xff]   ;;  %1226 = vmatprep.subr.bf16.mxu1 %v1433_v22 }
  0x1b   : > { %1188 = vmatprep.mubr.msk.bf16.mxu0 %vm485_vm2, %v1320_v6  ;;  %v1323_v9 = vld [vmem:[%s1550_s11 + $0x18] sm:$0xff]   ;;  %v1324_v10 = vld [vmem:[%s1550_s11 + $0x20] sm:$0xff]   ;;  %v1325_v11 = vld [vmem:[%s1550_s11 + $0x28] sm:$0xff]  }
  0x1c   : > { %1189 = vmatmul.mubr.msk.bf16.vlgmr.msra.gmra.mrb[0].mxu0 %vm485_vm2, %v1321_v7  ;;  %v1326_v12 = vld [vmem:[%s1550_s11 + $0x30] sm:$0xff]   ;;  %v1327_v13 = vld [vmem:[%s1550_s11 + $0x38] sm:$0xff]   ;;  %v1328_v14 = vld [vmem:[%s1550_s11 + $0x40] sm:$0xff]  }
  0x1d   : > { %1192 = vmatprep.mubr.msk.bf16.mxu0 %vm485_vm2, %v1322_v8  ;;  %v1329_v15 = vld [vmem:[%s1550_s11 + $0x48] sm:$0xff]   ;;  %v1330_v16 = vld [vmem:[%s1550_s11 + $0x50] sm:$0xff]   ;;  %v1331_v17 = vld [vmem:[%s1550_s11 + $0x58] sm:$0xff]   ;;  %1227 = vmatpush3.bf16.msra.mxu1 %v1339_v26 }
  0x1e   : > { %v1332_v18 = vld [vmem:[%s1550_s11 + $0x60] sm:$0xff]   ;;  %v1333_v19 = vld [vmem:[%s1550_s11 + $0x68] sm:$0xff]   ;;  %v1334_v20 = vld [vmem:[%s1550_s11 + $0x70] sm:$0xff]   ;;  %1228 = vmatprep.subr.bf16.mxu1 %v1433_v22 }
  0x1f   : > { %v1335_v21 = vld [vmem:[%s1550_s11 + $0x78] sm:$0xff]   ;;  %s331_s11 = scalar_lea.vmem [#allocation3], %s330_s22 }
  0x20   : > { %s1008_s12 = sshll.u32 %s331_s11, 4  ;;  %s1707_s12 = int_to_ptr.vmem [resolvable:$true] %s1008_s12 }
  0x21   : > { %1229 = vmatpush3.bf16.msra.mxu1 %v1340_v27  ;;  %s1352_s30 = scalar_lea.vmem %s1707_s12, 16 }
  0x22   : > { %1230 = vmatprep.subr.bf16.mxu1 %v1433_v22  ;;  %p1353_p12 = scmp.ne.s32.totalorder %s1707_s12, %s1352_s30 }
  0x24   : > { %1193 = vmatmul.mubr.msk.bf16.gmra.mrb[4].mxu0 %vm485_vm2, %v1323_v9  ;;  %p1354_p13 = pnand %p1353_p12, %p1521_p4 }
  0x25   : > { %1196 = vmatprep.mubr.msk.bf16.mxu0 %vm485_vm2, %v1324_v10  ;;  %1231 = vmatpush3.bf16.msra.mxu1 %v1341_v28 }
  0x26   : > { %1232 = vmatprep.subr.bf16.mxu1 %v1433_v22  ;;  %p1355_p0 = pneg %p1354_p13 }
  0x29   : > { %1233 = vmatpush3.bf16.msra.mxu1 %v1342_v29 }
  0x2a   : > { %1234 = vmatprep.subr.bf16.mxu1 %v1433_v22 }
  0x2c   : > { %1197 = vmatmul.mubr.msk.bf16.gmra.mrb[8].mxu0 %vm485_vm2, %v1325_v11 }
  0x2d   : > { %1200 = vmatprep.mubr.msk.bf16.mxu0 %vm485_vm2, %v1326_v12  ;;  %1235 = vmatpush3.bf16.msra.mxu1 %v1343_v30 }
  0x2e   : > { %1240 = vmatprep.subr.bf16.mxu1 %v1433_v22 }
  0x34   : > { %1201 = vmatmul.mubr.msk.bf16.gmra.mrb[12].mxu0 %vm485_vm2, %v1327_v13 }
  0x35   : > { %1204 = vmatprep.mubr.msk.bf16.mxu0 %vm485_vm2, %v1328_v14 }
  0x3c   : > { %1205 = vmatmul.mubr.msk.bf16.gmra.mrb[16].mxu0 %vm485_vm2, %v1329_v15 }
  0x3d   : > { %1208 = vmatprep.mubr.msk.bf16.mxu0 %vm485_vm2, %v1330_v16 }
  0x44   : > { %1209 = vmatmul.mubr.msk.bf16.gmra.mrb[20].mxu0 %vm485_vm2, %v1331_v17 }
  0x45   : > { %1212 = vmatprep.mubr.msk.bf16.mxu0 %vm485_vm2, %v1332_v18 }
  0x4c   : > { %1213 = vmatmul.mubr.msk.bf16.gmra.mrb[24].mxu0 %vm485_vm2, %v1333_v19 }
  0x4d   : > { %1216 = vmatprep.mubr.msk.bf16.mxu0 %vm485_vm2, %v1334_v20 }
  0x54   : > { %1217 = vmatmul.mubr.msk.bf16.gmra.mrb[28].mxu0 %vm485_vm2, %v1335_v21 }
  0xef   : > { %v1190_v32 = vpop.f32.mrb[0].mxu0 }
  0xf0   : > { %v575_v33 = vpop.f32.mrb[1].mxu0  ;;  %v584_v37 = vadd.f32 %v1190_v32, %v1623_v31 }
  0xf1   : > { %v576_v34 = vadd.f32 %v1623_v31, %v575_v33  ;;  %v1191_v35 = vpop.f32.mrb[2].mxu0 }
  0xf2   : > { %v578_v36 = vpop.f32.mrb[3].mxu0  ;;  %v587_v40 = vadd.f32 %v1191_v35, %v1623_v31  ;;  %v704_v42 = vmax.f32 %v584_v37, 0.0 }
  0xf3   : > { %v579_v38 = vadd.f32 %v1623_v31, %v578_v36  ;;  %v702_v39 = vmax.f32 %v576_v34, 0.0 }
  0xf4   : > { %v705_v46 = vmax.f32 %v587_v40, 0.0 }
  0xf5   : > { %v703_v41 = vmax.f32 %v579_v38, 0.0 }
  0xf7   : > { %v735_v43 = vadd.f32 %v703_v41, %v702_v39  ;;  %v1194_v44 = vpop.f32.mrb[4].mxu0 }
  0xf8   : > { %v591_v45 = vpop.f32.mrb[5].mxu0  ;;  %v600_v51 = vadd.f32 %v1194_v44, %v1623_v31 }
  0xf9   : > { %v736_v47 = vadd.f32 %v735_v43, %v704_v42  ;;  %v592_v48 = vadd.f32 %v1623_v31, %v591_v45  ;;  %v1195_v49 = vpop.f32.mrb[6].mxu0 }
  0xfa   : > { %v594_v50 = vpop.f32.mrb[7].mxu0  ;;  %v603_v56 = vadd.f32 %v1195_v49, %v1623_v31  ;;  %v708_v58 = vmax.f32 %v600_v51, 0.0 }
  0xfb   : > { %v706_v52 = vmax.f32 %v592_v48, 0.0  ;;  %v737_v53 = vadd.f32 %v736_v47, %v705_v46  ;;  %v595_v54 = vadd.f32 %v1623_v31, %v594_v50 }
  0xfc   : > { %v709_v62 = vmax.f32 %v603_v56, 0.0 }
  0xfd   : > { %v738_v55 = vadd.f32 %v737_v53, %v706_v52  ;;  %v707_v57 = vmax.f32 %v595_v54, 0.0 }
  0xff   : > { %v739_v59 = vadd.f32 %v738_v55, %v707_v57  ;;  %v1198_v60 = vpop.f32.mrb[8].mxu0 }
 0x100   : > { %v607_v61 = vpop.f32.mrb[9].mxu0  ;;  %v616_v3 = vadd.f32 %v1198_v60, %v1623_v31 }
 0x101   : > { %v740_v63 = vadd.f32 %v739_v59, %v708_v58  ;;  %v608_v0 = vadd.f32 %v1623_v31, %v607_v61  ;;  %v1199_v1 = vpop.f32.mrb[10].mxu0 }
 0x102   : > { %v610_v2 = vpop.f32.mrb[11].mxu0  ;;  %v619_v8 = vadd.f32 %v1199_v1, %v1623_v31  ;;  %v712_v10 = vmax.f32 %v616_v3, 0.0 }
 0x103   : > { %v710_v4 = vmax.f32 %v608_v0, 0.0  ;;  %v741_v5 = vadd.f32 %v740_v63, %v709_v62  ;;  %v611_v6 = vadd.f32 %v1623_v31, %v610_v2 }
 0x104   : > { %v713_v14 = vmax.f32 %v619_v8, 0.0 }
 0x105   : > { %v742_v7 = vadd.f32 %v741_v5, %v710_v4  ;;  %v711_v9 = vmax.f32 %v611_v6, 0.0 }
 0x107   : > { %v743_v11 = vadd.f32 %v742_v7, %v711_v9  ;;  %v1202_v12 = vpop.f32.mrb[12].mxu0 }
 0x108   : > { %v623_v13 = vpop.f32.mrb[13].mxu0  ;;  %v632_v19 = vadd.f32 %v1202_v12, %v1623_v31 }
 0x109   : > { %v744_v15 = vadd.f32 %v743_v11, %v712_v10  ;;  %v624_v16 = vadd.f32 %v1623_v31, %v623_v13  ;;  %v1203_v17 = vpop.f32.mrb[14].mxu0 }
 0x10a   : > { %v626_v18 = vpop.f32.mrb[15].mxu0  ;;  %v635_v25 = vadd.f32 %v1203_v17, %v1623_v31  ;;  %v716_v27 = vmax.f32 %v632_v19, 0.0 }
 0x10b   : > { %v714_v20 = vmax.f32 %v624_v16, 0.0  ;;  %v745_v21 = vadd.f32 %v744_v15, %v713_v14  ;;  %v627_v23 = vadd.f32 %v1623_v31, %v626_v18 }
 0x10c   : > { %v717_v32 = vmax.f32 %v635_v25, 0.0 }
 0x10d   : > { %v746_v24 = vadd.f32 %v745_v21, %v714_v20  ;;  %v715_v26 = vmax.f32 %v627_v23, 0.0 }
 0x10f   : > { %v747_v28 = vadd.f32 %v746_v24, %v715_v26  ;;  %v1206_v29 = vpop.f32.mrb[16].mxu0 }
 0x110   : > { %v639_v30 = vpop.f32.mrb[17].mxu0  ;;  %v648_v37 = vadd.f32 %v1206_v29, %v1623_v31 }
 0x111   : > { %v748_v33 = vadd.f32 %v747_v28, %v716_v27  ;;  %v640_v34 = vadd.f32 %v1623_v31, %v639_v30  ;;  %v1207_v35 = vpop.f32.mrb[18].mxu0 }
 0x112   : > { %v642_v36 = vpop.f32.mrb[19].mxu0  ;;  %v651_v42 = vadd.f32 %v1207_v35, %v1623_v31  ;;  %v720_v44 = vmax.f32 %v648_v37, 0.0 }
 0x113   : > { %v718_v38 = vmax.f32 %v640_v34, 0.0  ;;  %v749_v39 = vadd.f32 %v748_v33, %v717_v32  ;;  %v643_v40 = vadd.f32 %v1623_v31, %v642_v36 }
 0x114   : > { %v721_v48 = vmax.f32 %v651_v42, 0.0 }
 0x115   : > { %v750_v41 = vadd.f32 %v749_v39, %v718_v38  ;;  %v719_v43 = vmax.f32 %v643_v40, 0.0  ;;  %v734_v40 = vld [vmem:[#allocation2] sm:$0x1] }
 0x117   : > { %v751_v45 = vadd.f32 %v750_v41, %v719_v43  ;;  %v1210_v46 = vpop.f32.mrb[20].mxu0 }
 0x118   : > { %v655_v47 = vpop.f32.mrb[21].mxu0  ;;  %v664_v53 = vadd.f32 %v1210_v46, %v1623_v31  ;;  %v1345_v46 = vld [vmem:[%s1758_s6 + $0x8] sm:$0xff]  }
 0x119   : > { %v752_v49 = vadd.f32 %v751_v45, %v720_v44  ;;  %v656_v50 = vadd.f32 %v1623_v31, %v655_v47  ;;  %v1211_v51 = vpop.f32.mrb[22].mxu0  ;;  %v1346_v47 = vld [vmem:[%s1758_s6 + $0x10] sm:$0xff]  }
 0x11a   : > { %v658_v52 = vpop.f32.mrb[23].mxu0  ;;  %v667_v58 = vadd.f32 %v1211_v51, %v1623_v31  ;;  %v724_v60 = vmax.f32 %v664_v53, 0.0  ;;  %v1350_v51 = vld [vmem:[%s1758_s6 + $0x30] sm:$0xff]   ;;  %v796_v53 = vld [vmem:[%s1756_s4] sm:$0x1] }
 0x11b   : > { %v722_v54 = vmax.f32 %v656_v50, 0.0  ;;  %v753_v55 = vadd.f32 %v752_v49, %v721_v48  ;;  %v659_v56 = vadd.f32 %v1623_v31, %v658_v52  ;;  %v1347_v48 = vld [vmem:[%s1758_s6 + $0x18] sm:$0xff]   ;;  %v1348_v49 = vld [vmem:[%s1758_s6 + $0x20] sm:$0xff]   ;;  %v1349_v50 = vld [vmem:[%s1758_s6 + $0x28] sm:$0xff]  }
 0x11c   : > { %v725_v0 = vmax.f32 %v667_v58, 0.0  ;;  %v1351_v52 = vld [vmem:[%s1758_s6 + $0x38] sm:$0xff]  }
 0x11d   : > { %v754_v57 = vadd.f32 %v753_v55, %v722_v54  ;;  %v723_v59 = vmax.f32 %v659_v56, 0.0 }
 0x11f   : > { %v755_v61 = vadd.f32 %v754_v57, %v723_v59  ;;  %v1214_v62 = vpop.f32.mrb[24].mxu0  ;;  %v886_v57 = vld [vmem:[%s344_s21] sm:$0x1]  ;;  %s1356_s21 = sshll.u32 %s1435_s20, 4  ;;  %s1357_s21 = int_to_ptr.vmem [resolvable:$false] %s1356_s21 }
 0x120   : > { %v671_v63 = vpop.f32.mrb[25].mxu0  ;;  %v680_v5 = vadd.f32 %v1214_v62, %v1623_v31  ;;  %v905_v62 = vld [vmem:[%s1759_s7] sm:$0x1]  ;;  %s1358_s24 = scalar_lea.vmem %s1357_s21, 32  ;;  %p1359_p1 = scmp.lt.s32.totalorder %s1707_s12, %s1357_s21 }
 0x121   : > { %v756_v1 = vadd.f32 %v755_v61, %v724_v60  ;;  %v672_v2 = vadd.f32 %v1623_v31, %v671_v63  ;;  %v1215_v3 = vpop.f32.mrb[26].mxu0  ;;  %p1360_p2 = scmp.lt.s32.totalorder %s1358_s24, %s1352_s30 }
 0x122   : > { %v674_v4 = vpop.f32.mrb[27].mxu0  ;;  %v683_v10 = vadd.f32 %v1215_v3, %v1623_v31  ;;  %v728_v12 = vmax.f32 %v680_v5, 0.0 }
 0x123   : > { %v726_v6 = vmax.f32 %v672_v2, 0.0  ;;  %v757_v7 = vadd.f32 %v756_v1, %v725_v0  ;;  %v675_v8 = vadd.f32 %v1623_v31, %v674_v4  ;;  %p1361_p3 = por %p1360_p2, %p1359_p1 }
 0x124   : > { %v729_v16 = vmax.f32 %v683_v10, 0.0 }
 0x125   : > { %v758_v9 = vadd.f32 %v757_v7, %v726_v6  ;;  %v727_v11 = vmax.f32 %v675_v8, 0.0  ;;  %p1362_p5 = pnand %p1361_p3, %p1355_p0 }
 0x127   : > { %v759_v13 = vadd.f32 %v758_v9, %v727_v11  ;;  %v1218_v14 = vpop.f32.mrb[28].mxu0 }
 0x128   : > { %v687_v15 = vpop.f32.mrb[29].mxu0  ;;  %v696_v21 = vadd.f32 %v1218_v14, %v1623_v31 }
 0x129   : > { %v760_v17 = vadd.f32 %v759_v13, %v728_v12  ;;  %v688_v18 = vadd.f32 %v1623_v31, %v687_v15  ;;  %v1219_v19 = vpop.f32.mrb[30].mxu0 }
 0x12a   : > { %v690_v20 = vpop.f32.mrb[31].mxu0  ;;  %v699_v27 = vadd.f32 %v1219_v19, %v1623_v31  ;;  %v732_v29 = vmax.f32 %v696_v21, 0.0 }
 0x12b   : > { %v730_v23 = vmax.f32 %v688_v18, 0.0  ;;  %v761_v24 = vadd.f32 %v760_v17, %v729_v16  ;;  %v691_v25 = vadd.f32 %v1623_v31, %v690_v20  ;;  %v1344_v31 = vld [vmem:[%s1758_s6] sm:$0xff]  }
 0x12c   : > { %v733_v32 = vmax.f32 %v699_v27, 0.0 }
 0x12d   : > { %v762_v26 = vadd.f32 %v761_v24, %v730_v23  ;;  %v731_v28 = vmax.f32 %v691_v25, 0.0 }
 0x12f   : > { %v763_v30 = vadd.f32 %v762_v26, %v731_v28 }
 0x131   : > { %v764_v33 = vadd.f32 %v763_v30, %v732_v29 }
 0x133   : > { %v765_v34 = vadd.f32 %v764_v33, %v733_v32 }
 0x135   : > { %v766_v35 = vrot.slane %v765_v34, 4 }
 0x137   : > { %v767_v36 = vadd.f32 %v766_v35, %v765_v34 }
 0x139   : > { %v768_v37 = vrot.slane %v767_v36, 2 }
 0x13b   : > { %v769_v38 = vadd.f32 %v768_v37, %v767_v36 }
 0x13d   : > { %v770_v39 = vrot.slane %v769_v38, 1 }
 0x13f   : > { %v771_v41 = vadd.f32 %v770_v39, %v769_v38 }
 0x141   : > { %v772_v42 = vadd.f32 %v771_v41, %v734_v40 }
 0x143   : > { %773 = vst [vmem:[#allocation2] sm:$0x1] %v772_v42 }
 0x14a   : > { %v777_v43 = vld [vmem:[#allocation2] sm:$0x1] }
 0x14b   : > { %v778_v44 = vmul.f32 0.00390625, %v777_v43 }
 0x14d   : > { %v779_v45 = vpack.c.bf16 %v778_v44, %v778_v44 }
 0x14f   : > { %1237 = vmatmul.mubr.bf16.vlgmr.msra.gmra.mrb[0].mxu1 %v779_v45 }
 0x150   : > { %1241 = vmatpush3.bf16.msra.mxu1 %v1344_v31  ;;  %1256 = vmatprep.mubr.msk.bf16.mxu1 %vm1434_vm3, %v1433_v22 }
 0x151   : > { %1242 = vmatprep.subr.bf16.mxu1 %v1433_v22 }
 0x154   : > { %1243 = vmatpush3.bf16.msra.mxu1 %v1345_v46 }
 0x155   : > { %1244 = vmatprep.subr.bf16.mxu1 %v1433_v22 }
 0x158   : > { %1245 = vmatpush3.bf16.msra.mxu1 %v1346_v47 }
 0x159   : > { %1246 = vmatprep.subr.bf16.mxu1 %v1433_v22 }
 0x15c   : > { %1247 = vmatpush3.bf16.msra.mxu1 %v1347_v48 }
 0x15d   : > { %1248 = vmatprep.subr.bf16.mxu1 %v1433_v22 }
 0x160   : > { %1249 = vmatpush3.bf16.msra.mxu1 %v1348_v49 }
 0x161   : > { %1250 = vmatprep.subr.bf16.mxu1 %v1433_v22 }
 0x164   : > { %1251 = vmatpush3.bf16.msra.mxu1 %v1349_v50 }
 0x165   : > { %1252 = vmatprep.subr.bf16.mxu1 %v1433_v22 }
 0x168   : > { %1253 = vmatpush3.bf16.msra.mxu1 %v1350_v51 }
 0x169   : > { %1254 = vmatprep.subr.bf16.mxu1 %v1433_v22 }
 0x16c   : > { %1255 = vmatpush3.bf16.msra.mxu1 %v1351_v52 }
 0x222   : > { %v879_v54 = vpop.f32.mrb[0].mxu1 }
 0x223   : > { %v880_v55 = vadd.f32 %v879_v54, %v796_v53  ;;  %v1238_v56 = vpop.f32.mrb[1].mxu1 }
 0x224   : > { %v882_v58 = vpop.f32.mrb[2].mxu1 }
 0x225   : > { %v885_v22 = vmax.f32 %v880_v55, 0.0  ;;  %v1239_v59 = vpop.f32.mrb[3].mxu1 }
 0x227   : > { %v887_v60 = vmul.f32 %v886_v57, %v885_v22 }
 0x229   : > { %v888_v61 = vpack.c.bf16 %v887_v60, %v887_v60 }
 0x22b   : > { %1257 = vmatmul.mubr.bf16.vlgmr.msra.gmra.mrb[4].mxu1 %v888_v61 }
 0x2fe   : > { %v988_v63 = vpop.f32.mrb[4].mxu1 }
 0x2ff   : > { %v989_v0 = vadd.f32 %v988_v63, %v905_v62  ;;  %v1258_v1 = vpop.f32.mrb[5].mxu1 }
 0x300   : > { %v991_v2 = vpop.f32.mrb[6].mxu1 }
 0x301   : > { %994 = vst [vmem:[%s331_s11] sm:$0x1] %v989_v0  ;;  %v1259_v3 = vpop.f32.mrb[7].mxu1 }
 0x302   : > { %1365 = shalt.err (!%p1362_p5)
}
 0x303   : > { %s1366_s22 = scalar_lea.hbm %s1705_s16, 16  ;;  %s1370_s11 = scalar_lea.hbm %s1760_s8, 32 }
 0x304   : > { %p1367_p6 = scmp.ne.s32.totalorder %s1705_s16, %s1366_s22  ;;  %p1371_p10 = scmp.lt.u32.totalorder %s1705_s16, %s1760_s8 }
 0x305   : > { %p1372_p11 = scmp.lt.u32.totalorder %s1370_s11, %s1366_s22  ;;  %p1374_p13 = scmp.lt.u32.totalorder %s1366_s22, %s1705_s16 }
 0x306   : > { %p1368_p7 = pnand %p1367_p6, %p1521_p4 }
 0x307   : > { %p1373_p12 = por %p1372_p11, %p1371_p10 }
 0x308   : > { %p1369_p9 = pneg %p1368_p7 }
 0x309   : > { %p1375_p0 = por %p1374_p13, %p1373_p12 }
 0x30b   : > { %p1376_p1 = pnand %p1375_p0, %p1369_p9 }
 0x30d   : > { %1379 = shalt.err (!%p1376_p1)
}
 0x30e   : > { %1260 = dma.vmem_to_hbm [thread:$0]  (%p1521_p4), %s1707_s12, 16, %s1705_s16, %s996_s19  }
 0x30f PF: > { %p1266_p2 = scmp.ge.s32.totalorder %s1430_s10, 2  ;;  %s1020_s30 = sand.u32 1, %s1410_s27  }
 0x310   : > { %s1021_s20 = scalar_lea.sflag [#allocation4], %s1020_s30 }
 0x311   : > { %p1263_p3 = pnand %p1266_p2, %p1528_p8 }
 0x313   : > { %1405 = dma.done.wait (!%p1263_p3), %s1021_s20, 16  }
 0x314   : > { %1407 = vsyncadd (!%p1263_p3), %s1021_s20, 4294967280  ;;  %s21_s10 = sadd.s32 1, %s1430_s10   ;;  %s1763_s27 = smov %s1414_s28 }
 0x315   : > { %p18_p5 = scmp.ge.s32.totalorder %s21_s10, 4   ;;  %s1764_s28 = smov %s1418_s29 }
 0x316   : > { %s1765_s29 = smov %s1534_s18  ;;  %s1766_s30 = smov %s1426_s9 }
 0x317   : > { %s1767_s9 = smov %s1769_s13  ;;  %20 = sbr.rel (!%p18_p5) target bundleno = 4 (0x4), region = 98 }
 0x31e   :  { %1025 = vsyncpa [#allocation4], 1 }
 0x31f   :  { %1027 = vsyncpa [#allocation4 + $0x1], 1 }

</bundles_post_ra>
